<compile_context>
chip_gen: v7x
topology: tpu7x:2x2x1
jax: 0.10.0
libtpu: 0.0.40
codegen_flags: <defaults>
</compile_context>

<pallas_src>
import jax
import jax.numpy as jnp
from jax.experimental import pallas as pl
from jax.experimental.pallas import tpu as pltpu

INPUT_SIZE = 784
HIDDEN = 100
OUTPUT_SIZE = 5
BN_EPS = 1e-5
GAIN = 1.0

# Lane-aligned padded sizes (multiples of 128).
IN_PAD = 896          # 7 * 128
HID_PAD = 128
OUT_PAD = 128
MAX_BATCH_TILE = 512  # multiple of 256 (v6e/v7x MXU) and 128 (v5e); fits v7x scoped VMEM


def _round_up(n, m):
    return ((n + m - 1) // m) * m


def mlp_kernel(x_ref, w1, w2, w3, w4, w5, w6, w7, bias_ref, out_ref):
    b = bias_ref[...]                      # (8, 128) f32; row i = folded bias of layer i+1
    h = x_ref[...].astype(jnp.bfloat16)    # bf16 activations, f32 MXU accumulation

    def layer(h, w_ref, row):
        z = jnp.dot(h, w_ref[...], preferred_element_type=jnp.float32)
        z = z + b[row:row + 1, :]
        return jnp.maximum(z, 0.0).astype(jnp.bfloat16)

    h = layer(h, w1, 0)
    h = layer(h, w2, 1)
    h = layer(h, w3, 2)
    h = layer(h, w4, 3)
    h = layer(h, w5, 4)
    h = layer(h, w6, 5)

    # fc7 -> ReLU -> softmax over the first OUTPUT_SIZE lanes (padded lanes masked out)
    z = jnp.dot(h, w7[...], preferred_element_type=jnp.float32) + b[6:7, :]
    z = jnp.maximum(z, 0.0)
    col = jax.lax.broadcasted_iota(jnp.int32, z.shape, 1)
    z = jnp.where(col < OUTPUT_SIZE, z, -1e30)
    z = z - jnp.max(z, axis=1, keepdims=True)
    e = jnp.exp(z)
    inv = pl.reciprocal(jnp.sum(e, axis=1, keepdims=True), approx=True)
    out_ref[...] = e * inv


def make_params(key):
    """Xavier-normal weights + uniform biases, BN folded in, padded to lane multiples."""
    sizes = [(INPUT_SIZE, HIDDEN)] + [(HIDDEN, HIDDEN)] * 5 + [(HIDDEN, OUTPUT_SIZE)]
    pad_in = [IN_PAD] + [HID_PAD] * 6
    pad_out = [HID_PAD] * 6 + [OUT_PAD]
    weights = []
    bias_rows = []
    for i, (fan_in, fan_out) in enumerate(sizes):
        key, kw, kb = jax.random.split(key, 3)
        # xavier_normal_: std = gain * sqrt(2 / (fan_in + fan_out))
        std = GAIN * (2.0 / (fan_in + fan_out)) ** 0.5
        w = std * jax.random.normal(kw, (fan_in, fan_out), dtype=jnp.float32)
        # Linear bias default init: U(-1/sqrt(fan_in), 1/sqrt(fan_in))
        bound = 1.0 / (fan_in ** 0.5)
        bvec = jax.random.uniform(kb, (fan_out,), dtype=jnp.float32,
                                  minval=-bound, maxval=bound)
        if i < 6:
            # Fold eval-mode BatchNorm (fresh stats: gamma=1, beta=0, mean=0, var=1)
            gamma = jnp.ones((fan_out,), jnp.float32)
            beta = jnp.zeros((fan_out,), jnp.float32)
            r_mean = jnp.zeros((fan_out,), jnp.float32)
            r_var = jnp.ones((fan_out,), jnp.float32)
            scale = gamma / jnp.sqrt(r_var + BN_EPS)
            shift = beta - r_mean * scale
            w = w * scale[None, :]
            bvec = bvec * scale + shift
        w_p = jnp.zeros((pad_in[i], pad_out[i]), jnp.float32)
        w_p = w_p.at[:fan_in, :fan_out].set(w)
        weights.append(w_p.astype(jnp.bfloat16))
        b_p = jnp.zeros((HID_PAD,), jnp.float32).at[:fan_out].set(bvec)
        bias_rows.append(b_p)
    bias_pack = jnp.zeros((8, HID_PAD), jnp.float32)
    bias_pack = bias_pack.at[:7, :].set(jnp.stack(bias_rows))
    return weights, bias_pack


@jax.jit
def net_forward(x, w1, w2, w3, w4, w5, w6, w7, bias_pack):
    b_raw, f_raw = x.shape
    tb = min(_round_up(b_raw, 8), MAX_BATCH_TILE)
    b_pad = _round_up(b_raw, tb)
    x_p = jnp.zeros((b_pad, IN_PAD), jnp.float32).at[:b_raw, :f_raw].set(x)

    full = lambda i: (0, 0)
    out = pl.pallas_call(
        mlp_kernel,
        out_shape=jax.ShapeDtypeStruct((b_pad, OUT_PAD), jnp.float32),
        grid=(b_pad // tb,),
        in_specs=[
            pl.BlockSpec((tb, IN_PAD), lambda i: (i, 0)),
            pl.BlockSpec((IN_PAD, HID_PAD), full),
            pl.BlockSpec((HID_PAD, HID_PAD), full),
            pl.BlockSpec((HID_PAD, HID_PAD), full),
            pl.BlockSpec((HID_PAD, HID_PAD), full),
            pl.BlockSpec((HID_PAD, HID_PAD), full),
            pl.BlockSpec((HID_PAD, HID_PAD), full),
            pl.BlockSpec((HID_PAD, OUT_PAD), full),
            pl.BlockSpec((8, HID_PAD), full),
        ],
        out_specs=pl.BlockSpec((tb, OUT_PAD), lambda i: (i, 0)),
        compiler_params=pltpu.CompilerParams(
            dimension_semantics=("parallel",),
        ),
    )(x_p, w1, w2, w3, w4, w5, w6, w7, bias_pack)
    return out[:b_raw, :OUTPUT_SIZE]


def reference_forward(x, weights, bias_pack):
    """Pure-JAX f32 reference on the same (padded, folded) parameters."""
    h = jnp.zeros((x.shape[0], IN_PAD), jnp.float32).at[:, :INPUT_SIZE].set(x)
    for i in range(6):
        h = jnp.maximum(h @ weights[i].astype(jnp.float32) + bias_pack[i], 0.0)
    z = jnp.maximum(h @ weights[6].astype(jnp.float32) + bias_pack[6], 0.0)
    z = z[:, :OUTPUT_SIZE]
    z = z - jnp.max(z, axis=1, keepdims=True)
    e = jnp.exp(z)
    return e / jnp.sum(e, axis=1, keepdims=True)


if __name__ == "__main__":
    key = jax.random.PRNGKey(0)
    key, kx, kp = jax.random.split(key, 3)

    batch = 8
    x = jax.random.normal(kx, (batch, INPUT_SIZE), dtype=jnp.float32)
    weights, bias_pack = make_params(kp)

    out = net_forward(x, *weights, bias_pack)
    jax.block_until_ready(out)

    assert out.shape == (batch, OUTPUT_SIZE)
    # softmax rows must sum to 1 (approx reciprocal -> loose tolerance)
    assert jnp.allclose(jnp.sum(out, axis=1), 1.0, atol=5e-3)
    # sanity check against pure-JAX f32 reference (bf16 matmuls -> loose tolerance)
    ref = reference_forward(x, weights, bias_pack)
    assert jnp.allclose(out, ref, atol=5e-2)
    print("KERNEL_OK")
</pallas_src>

<mosaic_0001>
module attributes {stable_mosaic.version = 11 : i64} {
  func.func @mlp_kernel(%arg0: i32, %arg1: memref<8x896xf32, #tpu.memory_space<vmem>>, %arg2: memref<896x128xbf16, #tpu.memory_space<vmem>>, %arg3: memref<128x128xbf16, #tpu.memory_space<vmem>>, %arg4: memref<128x128xbf16, #tpu.memory_space<vmem>>, %arg5: memref<128x128xbf16, #tpu.memory_space<vmem>>, %arg6: memref<128x128xbf16, #tpu.memory_space<vmem>>, %arg7: memref<128x128xbf16, #tpu.memory_space<vmem>>, %arg8: memref<128x128xbf16, #tpu.memory_space<vmem>>, %arg9: memref<8x128xf32, #tpu.memory_space<vmem>>, %arg10: memref<8x128xf32, #tpu.memory_space<vmem>>) attributes {dimension_semantics = [#tpu.dimension_semantics<parallel>], iteration_bounds = array<i64: 1>, scalar_prefetch = 0 : i64, scratch_operands = 0 : i64, tpu.core_type = #tpu.core_type<tc>, window_params = [{transform_indices = @transform_0, window_bounds = array<i64: 8, 896>}, {pipeline_mode = #tpu.pipeline_mode<synchronous>, transform_indices = @transform_1, window_bounds = array<i64: 896, 128>}, {pipeline_mode = #tpu.pipeline_mode<synchronous>, transform_indices = @transform_2, window_bounds = array<i64: 128, 128>}, {pipeline_mode = #tpu.pipeline_mode<synchronous>, transform_indices = @transform_3, window_bounds = array<i64: 128, 128>}, {pipeline_mode = #tpu.pipeline_mode<synchronous>, transform_indices = @transform_4, window_bounds = array<i64: 128, 128>}, {pipeline_mode = #tpu.pipeline_mode<synchronous>, transform_indices = @transform_5, window_bounds = array<i64: 128, 128>}, {pipeline_mode = #tpu.pipeline_mode<synchronous>, transform_indices = @transform_6, window_bounds = array<i64: 128, 128>}, {pipeline_mode = #tpu.pipeline_mode<synchronous>, transform_indices = @transform_7, window_bounds = array<i64: 128, 128>}, {pipeline_mode = #tpu.pipeline_mode<synchronous>, transform_indices = @transform_8, window_bounds = array<i64: 8, 128>}, {transform_indices = @transform_9, window_bounds = array<i64: 8, 128>}]} {
    %c0 = arith.constant 0 : index
    %c0_0 = arith.constant 0 : index
    %0 = vector.load %arg9[%c0, %c0_0] : memref<8x128xf32, #tpu.memory_space<vmem>>, vector<8x128xf32>
    %c0_1 = arith.constant 0 : index
    %c0_2 = arith.constant 0 : index
    %1 = vector.load %arg1[%c0_1, %c0_2] : memref<8x896xf32, #tpu.memory_space<vmem>>, vector<8x896xf32>
    %2 = arith.truncf %1 : vector<8x896xf32> to vector<8x896xbf16>
    %c0_3 = arith.constant 0 : index
    %c0_4 = arith.constant 0 : index
    %3 = vector.load %arg2[%c0_3, %c0_4] : memref<896x128xbf16, #tpu.memory_space<vmem>>, vector<896x128xbf16>
    %cst = arith.constant dense<0.000000e+00> : vector<8x128xf32>
    %4 = tpu.matmul %2, %3, %cst {dimension_numbers = #tpu.dot_dimension_numbers<[1], [0], [0], [1], [0, 0, 1, 1], [], []>} : vector<8x896xbf16>, vector<896x128xbf16>, vector<8x128xf32> -> vector<8x128xf32>
    %5 = vector.extract_strided_slice %0 {offsets = [0, 0], sizes = [1, 128], strides = [1, 1]} : vector<8x128xf32> to vector<1x128xf32>
    %6 = vector.broadcast %5 : vector<1x128xf32> to vector<8x128xf32>
    %7 = arith.addf %4, %6 : vector<8x128xf32>
    %cst_5 = arith.constant 0.000000e+00 : f32
    %8 = vector.broadcast %cst_5 : f32 to vector<8x128xf32>
    %9 = arith.maximumf %7, %8 : vector<8x128xf32>
    %10 = arith.truncf %9 : vector<8x128xf32> to vector<8x128xbf16>
    %c0_6 = arith.constant 0 : index
    %c0_7 = arith.constant 0 : index
    %11 = vector.load %arg3[%c0_6, %c0_7] : memref<128x128xbf16, #tpu.memory_space<vmem>>, vector<128x128xbf16>
    %cst_8 = arith.constant dense<0.000000e+00> : vector<8x128xf32>
    %12 = tpu.matmul %10, %11, %cst_8 {dimension_numbers = #tpu.dot_dimension_numbers<[1], [0], [0], [1], [0, 0, 1, 1], [], []>} : vector<8x128xbf16>, vector<128x128xbf16>, vector<8x128xf32> -> vector<8x128xf32>
    %13 = vector.extract_strided_slice %0 {offsets = [1, 0], sizes = [1, 128], strides = [1, 1]} : vector<8x128xf32> to vector<1x128xf32>
    %14 = vector.broadcast %13 : vector<1x128xf32> to vector<8x128xf32>
    %15 = arith.addf %12, %14 : vector<8x128xf32>
    %cst_9 = arith.constant 0.000000e+00 : f32
    %16 = vector.broadcast %cst_9 : f32 to vector<8x128xf32>
    %17 = arith.maximumf %15, %16 : vector<8x128xf32>
    %18 = arith.truncf %17 : vector<8x128xf32> to vector<8x128xbf16>
    %c0_10 = arith.constant 0 : index
    %c0_11 = arith.constant 0 : index
    %19 = vector.load %arg4[%c0_10, %c0_11] : memref<128x128xbf16, #tpu.memory_space<vmem>>, vector<128x128xbf16>
    %cst_12 = arith.constant dense<0.000000e+00> : vector<8x128xf32>
    %20 = tpu.matmul %18, %19, %cst_12 {dimension_numbers = #tpu.dot_dimension_numbers<[1], [0], [0], [1], [0, 0, 1, 1], [], []>} : vector<8x128xbf16>, vector<128x128xbf16>, vector<8x128xf32> -> vector<8x128xf32>
    %21 = vector.extract_strided_slice %0 {offsets = [2, 0], sizes = [1, 128], strides = [1, 1]} : vector<8x128xf32> to vector<1x128xf32>
    %22 = vector.broadcast %21 : vector<1x128xf32> to vector<8x128xf32>
    %23 = arith.addf %20, %22 : vector<8x128xf32>
    %cst_13 = arith.constant 0.000000e+00 : f32
    %24 = vector.broadcast %cst_13 : f32 to vector<8x128xf32>
    %25 = arith.maximumf %23, %24 : vector<8x128xf32>
    %26 = arith.truncf %25 : vector<8x128xf32> to vector<8x128xbf16>
    %c0_14 = arith.constant 0 : index
    %c0_15 = arith.constant 0 : index
    %27 = vector.load %arg5[%c0_14, %c0_15] : memref<128x128xbf16, #tpu.memory_space<vmem>>, vector<128x128xbf16>
    %cst_16 = arith.constant dense<0.000000e+00> : vector<8x128xf32>
    %28 = tpu.matmul %26, %27, %cst_16 {dimension_numbers = #tpu.dot_dimension_numbers<[1], [0], [0], [1], [0, 0, 1, 1], [], []>} : vector<8x128xbf16>, vector<128x128xbf16>, vector<8x128xf32> -> vector<8x128xf32>
    %29 = vector.extract_strided_slice %0 {offsets = [3, 0], sizes = [1, 128], strides = [1, 1]} : vector<8x128xf32> to vector<1x128xf32>
    %30 = vector.broadcast %29 : vector<1x128xf32> to vector<8x128xf32>
    %31 = arith.addf %28, %30 : vector<8x128xf32>
    %cst_17 = arith.constant 0.000000e+00 : f32
    %32 = vector.broadcast %cst_17 : f32 to vector<8x128xf32>
    %33 = arith.maximumf %31, %32 : vector<8x128xf32>
    %34 = arith.truncf %33 : vector<8x128xf32> to vector<8x128xbf16>
    %c0_18 = arith.constant 0 : index
    %c0_19 = arith.constant 0 : index
    %35 = vector.load %arg6[%c0_18, %c0_19] : memref<128x128xbf16, #tpu.memory_space<vmem>>, vector<128x128xbf16>
    %cst_20 = arith.constant dense<0.000000e+00> : vector<8x128xf32>
    %36 = tpu.matmul %34, %35, %cst_20 {dimension_numbers = #tpu.dot_dimension_numbers<[1], [0], [0], [1], [0, 0, 1, 1], [], []>} : vector<8x128xbf16>, vector<128x128xbf16>, vector<8x128xf32> -> vector<8x128xf32>
    %37 = vector.extract_strided_slice %0 {offsets = [4, 0], sizes = [1, 128], strides = [1, 1]} : vector<8x128xf32> to vector<1x128xf32>
    %38 = vector.broadcast %37 : vector<1x128xf32> to vector<8x128xf32>
    %39 = arith.addf %36, %38 : vector<8x128xf32>
    %cst_21 = arith.constant 0.000000e+00 : f32
    %40 = vector.broadcast %cst_21 : f32 to vector<8x128xf32>
    %41 = arith.maximumf %39, %40 : vector<8x128xf32>
    %42 = arith.truncf %41 : vector<8x128xf32> to vector<8x128xbf16>
    %c0_22 = arith.constant 0 : index
    %c0_23 = arith.constant 0 : index
    %43 = vector.load %arg7[%c0_22, %c0_23] : memref<128x128xbf16, #tpu.memory_space<vmem>>, vector<128x128xbf16>
    %cst_24 = arith.constant dense<0.000000e+00> : vector<8x128xf32>
    %44 = tpu.matmul %42, %43, %cst_24 {dimension_numbers = #tpu.dot_dimension_numbers<[1], [0], [0], [1], [0, 0, 1, 1], [], []>} : vector<8x128xbf16>, vector<128x128xbf16>, vector<8x128xf32> -> vector<8x128xf32>
    %45 = vector.extract_strided_slice %0 {offsets = [5, 0], sizes = [1, 128], strides = [1, 1]} : vector<8x128xf32> to vector<1x128xf32>
    %46 = vector.broadcast %45 : vector<1x128xf32> to vector<8x128xf32>
    %47 = arith.addf %44, %46 : vector<8x128xf32>
    %cst_25 = arith.constant 0.000000e+00 : f32
    %48 = vector.broadcast %cst_25 : f32 to vector<8x128xf32>
    %49 = arith.maximumf %47, %48 : vector<8x128xf32>
    %50 = arith.truncf %49 : vector<8x128xf32> to vector<8x128xbf16>
    %c0_26 = arith.constant 0 : index
    %c0_27 = arith.constant 0 : index
    %51 = vector.load %arg8[%c0_26, %c0_27] : memref<128x128xbf16, #tpu.memory_space<vmem>>, vector<128x128xbf16>
    %cst_28 = arith.constant dense<0.000000e+00> : vector<8x128xf32>
    %52 = tpu.matmul %50, %51, %cst_28 {dimension_numbers = #tpu.dot_dimension_numbers<[1], [0], [0], [1], [0, 0, 1, 1], [], []>} : vector<8x128xbf16>, vector<128x128xbf16>, vector<8x128xf32> -> vector<8x128xf32>
    %53 = vector.extract_strided_slice %0 {offsets = [6, 0], sizes = [1, 128], strides = [1, 1]} : vector<8x128xf32> to vector<1x128xf32>
    %54 = vector.broadcast %53 : vector<1x128xf32> to vector<8x128xf32>
    %55 = arith.addf %52, %54 : vector<8x128xf32>
    %cst_29 = arith.constant 0.000000e+00 : f32
    %56 = vector.broadcast %cst_29 : f32 to vector<8x128xf32>
    %57 = arith.maximumf %55, %56 : vector<8x128xf32>
    %58 = tpu.iota {dimensions = array<i32: 1>} : vector<8x128xi32>
    %c5_i32 = arith.constant 5 : i32
    %59 = vector.broadcast %c5_i32 : i32 to vector<8x128xi32>
    %60 = arith.cmpi slt, %58, %59 : vector<8x128xi32>
    %cst_30 = arith.constant -1.000000e+30 : f32
    %61 = vector.broadcast %cst_30 : f32 to vector<8x128xf32>
    %62 = arith.select %60, %57, %61 : vector<8x128xi1>, vector<8x128xf32>
    %cst_31 = arith.constant dense<0xFF800000> : vector<8xf32>
    %63 = vector.multi_reduction <maximumf>, %62, %cst_31 [1] : vector<8x128xf32> to vector<8xf32>
    %64 = vector.shape_cast %63 : vector<8xf32> to vector<8x1xf32>
    %65 = vector.broadcast %64 : vector<8x1xf32> to vector<8x128xf32>
    %66 = arith.subf %62, %65 : vector<8x128xf32>
    %67 = math.exp %66 : vector<8x128xf32>
    %cst_32 = arith.constant dense<0.000000e+00> : vector<8xf32>
    %68 = vector.multi_reduction <add>, %67, %cst_32 [1] : vector<8x128xf32> to vector<8xf32>
    %69 = vector.shape_cast %68 : vector<8xf32> to vector<8x1xf32>
    %70 = tpu.reciprocal %69 {approx = true} : vector<8x1xf32> -> vector<8x1xf32>
    %71 = vector.broadcast %70 : vector<8x1xf32> to vector<8x128xf32>
    %72 = arith.mulf %67, %71 : vector<8x128xf32>
    %c0_33 = arith.constant 0 : index
    %c0_34 = arith.constant 0 : index
    %73 = vector.load %arg10[%c0_33, %c0_34] : memref<8x128xf32, #tpu.memory_space<vmem>>, vector<8x128xf32>
    tpu.vector_store %arg10[%c0_33, %c0_34], %72 {strides = array<i32>} : memref<8x128xf32, #tpu.memory_space<vmem>>, vector<8x128xf32>,
    return
  }
  func.func @transform_0(%arg0: i32) -> (i32, i32) {
    %c0_i32 = arith.constant 0 : i32
    %c0_i32_0 = arith.constant 0 : i32
    return %arg0, %c0_i32 : i32, i32
  }
  func.func @transform_1(%arg0: i32) -> (i32, i32) {
    %c0_i32 = arith.constant 0 : i32
    %c0_i32_0 = arith.constant 0 : i32
    %c0_i32_1 = arith.constant 0 : i32
    return %c0_i32, %c0_i32_0 : i32, i32
  }
  func.func @transform_2(%arg0: i32) -> (i32, i32) {
    %c0_i32 = arith.constant 0 : i32
    %c0_i32_0 = arith.constant 0 : i32
    %c0_i32_1 = arith.constant 0 : i32
    return %c0_i32, %c0_i32_0 : i32, i32
  }
  func.func @transform_3(%arg0: i32) -> (i32, i32) {
    %c0_i32 = arith.constant 0 : i32
    %c0_i32_0 = arith.constant 0 : i32
    %c0_i32_1 = arith.constant 0 : i32
    return %c0_i32, %c0_i32_0 : i32, i32
  }
  func.func @transform_4(%arg0: i32) -> (i32, i32) {
    %c0_i32 = arith.constant 0 : i32
    %c0_i32_0 = arith.constant 0 : i32
    %c0_i32_1 = arith.constant 0 : i32
    return %c0_i32, %c0_i32_0 : i32, i32
  }
  func.func @transform_5(%arg0: i32) -> (i32, i32) {
    %c0_i32 = arith.constant 0 : i32
    %c0_i32_0 = arith.constant 0 : i32
    %c0_i32_1 = arith.constant 0 : i32
    return %c0_i32, %c0_i32_0 : i32, i32
  }
  func.func @transform_6(%arg0: i32) -> (i32, i32) {
    %c0_i32 = arith.constant 0 : i32
    %c0_i32_0 = arith.constant 0 : i32
    %c0_i32_1 = arith.constant 0 : i32
    return %c0_i32, %c0_i32_0 : i32, i32
  }
  func.func @transform_7(%arg0: i32) -> (i32, i32) {
    %c0_i32 = arith.constant 0 : i32
    %c0_i32_0 = arith.constant 0 : i32
    %c0_i32_1 = arith.constant 0 : i32
    return %c0_i32, %c0_i32_0 : i32, i32
  }
  func.func @transform_8(%arg0: i32) -> (i32, i32) {
    %c0_i32 = arith.constant 0 : i32
    %c0_i32_0 = arith.constant 0 : i32
    %c0_i32_1 = arith.constant 0 : i32
    return %c0_i32, %c0_i32_0 : i32, i32
  }
  func.func @transform_9(%arg0: i32) -> (i32, i32) {
    %c0_i32 = arith.constant 0 : i32
    %c0_i32_0 = arith.constant 0 : i32
    return %arg0, %c0_i32 : i32, i32
  }
}

</mosaic_0001>

<bundles_post_ra>
// kernel: net_forward.1
= control target key start
LH: loop header
LB: loop body
LE: loop exit
PB: predicated region body
PF: predicated region fallthrough
CT: control target
= control target key end

     0   :  { %14 = vsyncpa [#allocation3], 0  ;;  %s2356_s0 = inlined_call_operand.vmem [shape: f32[8,896], index: 0, kind: input, shape index: {}]   ;;  %s2357_s1 = inlined_call_operand.hbm [shape: bf16[896,128], index: 1, kind: input, shape index: {}]   ;;  %s2358_s2 = inlined_call_operand.vmem [shape: bf16[128,128], index: 2, kind: input, shape index: {}]   ;;  %s2359_s3 = inlined_call_operand.vmem [shape: bf16[128,128], index: 3, kind: input, shape index: {}]   ;;  %s2360_s4 = inlined_call_operand.vmem [shape: bf16[128,128], index: 4, kind: input, shape index: {}]   ;;  %s2361_s5 = inlined_call_operand.hbm [shape: bf16[128,128], index: 5, kind: input, shape index: {}]   ;;  %s2362_s6 = inlined_call_operand.hbm [shape: bf16[128,128], index: 6, kind: input, shape index: {}]   ;;  %s2363_s7 = inlined_call_operand.vmem [shape: bf16[128,128], index: 7, kind: input, shape index: {}]   ;;  %s2364_s8 = inlined_call_operand.hbm [shape: f32[8,128], index: 8, kind: input, shape index: {}]   ;;  %s2365_s9 = inlined_call_operand.hbm [shape: f32[8,128], index: 9, kind: output, shape index: {}]  }
   0x1   :  { %15 = vsyncpa [#allocation6], 0 }
   0x2   :  { %16 = vsyncpa [#allocation9], 0 }
   0x3   :  { %17 = vsyncpa [#allocation4], 0  ;;  %s2014_s30 = smov [#allocation5]   ;;  %s2015_s11 = smov [#allocation2]  }
   0x4   :  { %s43_s10 = sshll.u32 %s2014_s30, 4  ;;  %s25_s12 = sshll.u32 %s2015_s11, 4  ;;  %s44_s10 = int_to_ptr.vmem [resolvable:$true] %s43_s10  ;;  %s2073_s12 = int_to_ptr.vmem [resolvable:$true] %s25_s12 }
   0x5   :  { %s1896_s15 = scalar_lea.hbm %s2361_s5, 1024 }
   0x6   :  { %p1897_p0 = scmp.ne.s32.totalorder %s2361_s5, %s1896_s15  ;;  %p1900_p1 = scmp.lt.u32.totalorder %s1896_s15, %s2361_s5 }
   0x8   :  { %p1902_p2 = pnand %p1900_p1, %p1897_p0 }
   0xa   :  { %1905 = shalt.err (!%p1902_p2)
}
   0xb   :  { %s1906_s20 = scalar_lea.vmem %s44_s10, 1024  ;;  %p1911_p4 = scmp.lt.s32.totalorder %s44_s10, %s44_s10 }
   0xc   :  { %p1907_p3 = scmp.ne.s32.totalorder %s44_s10, %s1906_s20  ;;  %p1912_p5 = scmp.lt.s32.totalorder %s1906_s20, %s1906_s20 }
   0xe   :  { %p1913_p6 = por %p1912_p5, %p1911_p4 }
  0x10   :  { %p1914_p7 = pnand %p1913_p6, %p1907_p3 }
  0x12   :  { %1917 = shalt.err (!%p1914_p7)
}
  0x13   :  { %s2016_s21 = smov 64   ;;  %s2017_s22 = smov 4  }
  0x14   :  { %49 = dma.hbm_to_vmem [thread:$0]  %s2361_s5, 1024, %s44_s10, [#allocation6], %s2016_s21, %s2016_s21, %s2017_s22  }
  0x15   :  { %s1918_s27 = scalar_lea.hbm %s2357_s1, 7168 }
  0x16   :  { %p1919_p8 = scmp.ne.s32.totalorder %s2357_s1, %s1918_s27  ;;  %p1922_p9 = scmp.lt.u32.totalorder %s1918_s27, %s2357_s1 }
  0x18   :  { %p1924_p10 = pnand %p1922_p9, %p1919_p8 }
  0x1a   :  { %1927 = shalt.err (!%p1924_p10)
}
  0x1b   :  { %s1928_s13 = scalar_lea.vmem %s2073_s12, 7168  ;;  %p1933_p12 = scmp.lt.s32.totalorder %s2073_s12, %s2073_s12 }
  0x1c   :  { %p1929_p11 = scmp.ne.s32.totalorder %s2073_s12, %s1928_s13  ;;  %p1934_p13 = scmp.lt.s32.totalorder %s1928_s13, %s1928_s13 }
  0x1e   :  { %p1935_p0 = por %p1934_p13, %p1933_p12 }
  0x20   :  { %p1936_p1 = pnand %p1935_p0, %p1929_p11 }
  0x22   :  { %1939 = shalt.err (!%p1936_p1)
}
  0x23   :  { %31 = dma.hbm_to_vmem [thread:$0]  %s2357_s1, 7168, %s2073_s12, [#allocation3], %s2016_s21, %s2016_s21, %s2017_s22  }
  0x24   :  { %s2018_s14 = smov [#allocation7]   ;;  %s2019_s16 = smov [#allocation8]  }
  0x25   :  { %s55_s15 = sshll.u32 %s2018_s14, 4  ;;  %s70_s17 = sshll.u32 %s2019_s16, 4  ;;  %s56_s15 = int_to_ptr.vmem [resolvable:$true] %s55_s15  ;;  %s71_s17 = int_to_ptr.vmem [resolvable:$true] %s70_s17 }
  0x26   :  { %s1940_s20 = scalar_lea.hbm %s2362_s6, 1024 }
  0x27   :  { %p1941_p2 = scmp.ne.s32.totalorder %s2362_s6, %s1940_s20  ;;  %p1944_p3 = scmp.lt.u32.totalorder %s1940_s20, %s2362_s6 }
  0x29   :  { %p1946_p4 = pnand %p1944_p3, %p1941_p2 }
  0x2b   :  { %1949 = shalt.err (!%p1946_p4)
}
  0x2c   :  { %s1950_s1 = scalar_lea.vmem %s56_s15, 1024  ;;  %p1955_p6 = scmp.lt.s32.totalorder %s56_s15, %s56_s15 }
  0x2d   :  { %p1951_p5 = scmp.ne.s32.totalorder %s56_s15, %s1950_s1  ;;  %p1956_p7 = scmp.lt.s32.totalorder %s1950_s1, %s1950_s1 }
  0x2f   :  { %p1957_p8 = por %p1956_p7, %p1955_p6 }
  0x31   :  { %p1958_p9 = pnand %p1957_p8, %p1951_p5 }
  0x33   :  { %1961 = shalt.err (!%p1958_p9)
}
  0x34   :  { %61 = dma.hbm_to_vmem [thread:$0]  %s2362_s6, 1024, %s56_s15, [#allocation6], %s2016_s21, %s2016_s21, %s2017_s22  }
  0x35   :  { %s1962_s30 = scalar_lea.hbm %s2364_s8, 128 }
  0x36   :  { %p1963_p10 = scmp.ne.s32.totalorder %s2364_s8, %s1962_s30  ;;  %p1966_p11 = scmp.lt.u32.totalorder %s1962_s30, %s2364_s8 }
  0x38   :  { %p1968_p12 = pnand %p1966_p11, %p1963_p10 }
  0x3a   :  { %1971 = shalt.err (!%p1968_p12)
}
  0x3b   :  { %s1972_s14 = scalar_lea.vmem %s71_s17, 128  ;;  %p1977_p0 = scmp.lt.s32.totalorder %s71_s17, %s71_s17 }
  0x3c   :  { %p1973_p13 = scmp.ne.s32.totalorder %s71_s17, %s1972_s14  ;;  %p1978_p1 = scmp.lt.s32.totalorder %s1972_s14, %s1972_s14 }
  0x3e   :  { %p1979_p2 = por %p1978_p1, %p1977_p0 }
  0x40   :  { %p1980_p3 = pnand %p1979_p2, %p1973_p13 }
  0x42   :  { %1983 = shalt.err (!%p1980_p3)
}
  0x43   :  { %73 = dma.hbm_to_vmem [thread:$0]  %s2364_s8, 128, %s71_s17, [#allocation9]  }
  0x44   :  { %2006 = dma.done.wait [#allocation3], 7168  }
  0x45   :  { %2007 = vsyncadd [#allocation3], 4294960128 }
  0x46   :  { %2008 = dma.done.wait [#allocation6], 2048  }
  0x47   :  { %2009 = vsyncadd [#allocation6], 4294965248 }
  0x48   :  { %2010 = dma.done.wait [#allocation9], 128  }
  0x49   :  { %2011 = vsyncadd [#allocation9], 4294967168  ;;  %v1788_v0 = vld [vmem:[#allocation2 + $0x40] sm:$0xff]   ;;  %v1792_v4 = vld [vmem:[#allocation2 + $0x48] sm:$0xff]   ;;  %v2020_v43 = vmov 0.0   ;;  %vm2021_vm0 = vmmov 0  }
  0x4a   :  { %v1789_v1 = vld [vmem:[#allocation2] sm:$0xff]   ;;  %1510 = vmatprep.subr.bf16.mxu0 %v1788_v0  ;;  %v1793_v5 = vld [vmem:[#allocation2 + $0x8] sm:$0xff]   ;;  %v1796_v8 = vld [vmem:[#allocation2 + $0x50] sm:$0xff]  }
  0x4b   :  { %v1790_v2 = vld [vmem:[#allocation2 + $0xc0] sm:$0xff]   ;;  %1511 = vmatpush3.bf16.msra.mxu0 %v1789_v1  ;;  %v1794_v6 = vld [vmem:[#allocation2 + $0xc8] sm:$0xff]   ;;  %v1797_v9 = vld [vmem:[#allocation2 + $0x10] sm:$0xff]  }
  0x4c   :  { %v1791_v3 = vld [vmem:[#allocation2 + $0x80] sm:$0xff]   ;;  %1532 = vmatprep.subr.bf16.mxu1 %v1790_v2  ;;  %1512 = vmatprep.subr.bf16.mxu0 %v1792_v4  ;;  %v1795_v7 = vld [vmem:[#allocation2 + $0x88] sm:$0xff]   ;;  %v1798_v10 = vld [vmem:[#allocation2 + $0xd0] sm:$0xff]  }
  0x4d   :  { %1533 = vmatpush3.bf16.msra.mxu1 %v1791_v3  ;;  %v1799_v11 = vld [vmem:[#allocation2 + $0x90] sm:$0xff]   ;;  %v1800_v12 = vld [vmem:[#allocation2 + $0x58] sm:$0xff]   ;;  %v1804_v16 = vld [vmem:[#allocation2 + $0x60] sm:$0xff]  }
  0x4e   :  { %1534 = vmatprep.subr.bf16.mxu1 %v1794_v6  ;;  %v1801_v13 = vld [vmem:[#allocation2 + $0x18] sm:$0xff]   ;;  %v1805_v17 = vld [vmem:[#allocation2 + $0x20] sm:$0xff]   ;;  %v1808_v20 = vld [vmem:[#allocation2 + $0x68] sm:$0xff]  }
  0x4f   :  { %1513 = vmatpush3.bf16.msra.mxu0 %v1793_v5  ;;  %v1802_v14 = vld [vmem:[#allocation2 + $0xd8] sm:$0xff]   ;;  %v1806_v18 = vld [vmem:[#allocation2 + $0xe0] sm:$0xff]   ;;  %v1809_v21 = vld [vmem:[#allocation2 + $0x28] sm:$0xff]  }
  0x50   :  { %1514 = vmatprep.subr.bf16.mxu0 %v1796_v8  ;;  %v1803_v15 = vld [vmem:[#allocation2 + $0x98] sm:$0xff]   ;;  %v1807_v19 = vld [vmem:[#allocation2 + $0xa0] sm:$0xff]   ;;  %v1810_v22 = vld [vmem:[#allocation2 + $0xe8] sm:$0xff]  }
  0x51   :  { %1535 = vmatpush3.bf16.msra.mxu1 %v1795_v7  ;;  %v1811_v23 = vld [vmem:[#allocation2 + $0xa8] sm:$0xff]   ;;  %v1812_v24 = vld [vmem:[#allocation2 + $0x70] sm:$0xff]   ;;  %v1816_v28 = vld [vmem:[#allocation2 + $0x78] sm:$0xff]  }
  0x52   :  { %1536 = vmatprep.subr.bf16.mxu1 %v1798_v10  ;;  %v1813_v25 = vld [vmem:[#allocation2 + $0x30] sm:$0xff]   ;;  %v1817_v29 = vld [vmem:[#allocation2 + $0x38] sm:$0xff]   ;;  %v89_v31 = vld [vmem:[%s2356_s0 + $0x8] sm:$0xff] }
  0x53   :  { %1515 = vmatpush3.bf16.msra.mxu0 %v1797_v9  ;;  %v1814_v26 = vld [vmem:[#allocation2 + $0xf0] sm:$0xff]   ;;  %v1818_v30 = vld [vmem:[#allocation2 + $0xf8] sm:$0xff]   ;;  %v96_v32 = vpack.c.bf16 %v89_v31, %v89_v31  ;;  %v88_v34 = vld [vmem:[%s2356_s0] sm:$0xff] }
  0x54   :  { %1516 = vmatprep.subr.bf16.mxu0 %v1800_v12  ;;  %v1815_v27 = vld [vmem:[#allocation2 + $0xb0] sm:$0xff]   ;;  %v1819_v33 = vld [vmem:[#allocation2 + $0xb8] sm:$0xff]   ;;  %v95_v35 = vpack.c.bf16 %v88_v34, %v88_v34  ;;  %v1820_v36 = vld [vmem:[#allocation2 + $0x140] sm:$0xff]  }
  0x55   :  { %1537 = vmatpush3.bf16.msra.mxu1 %v1799_v11  ;;  %v91_v37 = vld [vmem:[%s2356_s0 + $0x18] sm:$0xff]  ;;  %586 = vmatprep.mubr.bf16.mxu0 %v96_v32  ;;  %v1821_v39 = vld [vmem:[#allocation2 + $0x100] sm:$0xff]   ;;  %v90_v40 = vld [vmem:[%s2356_s0 + $0x10] sm:$0xff] }
  0x56   :  { %1538 = vmatprep.subr.bf16.mxu1 %v1802_v14  ;;  %v98_v38 = vpack.c.bf16 %v91_v37, %v91_v37  ;;  %v97_v41 = vpack.c.bf16 %v90_v40, %v90_v40  ;;  %v1822_v42 = vld [vmem:[#allocation2 + $0x180] sm:$0xff]   ;;  %v1823_v44 = vld [vmem:[#allocation2 + $0x148] sm:$0xff]   ;;  %v1826_v47 = vld [vmem:[#allocation2 + $0x150] sm:$0xff]  }
  0x57   :  { %1517 = vmatpush3.bf16.msra.mxu0 %v1801_v13  ;;  %v1824_v45 = vld [vmem:[#allocation2 + $0x108] sm:$0xff]   ;;  %v1827_v48 = vld [vmem:[#allocation2 + $0x110] sm:$0xff]   ;;  %v1829_v50 = vld [vmem:[#allocation2 + $0x158] sm:$0xff]  }
  0x58   :  { %1518 = vmatprep.subr.bf16.mxu0 %v1804_v16  ;;  %626 = vmatprep.mubr.bf16.mxu1 %v98_v38  ;;  %v1825_v46 = vld [vmem:[#allocation2 + $0x188] sm:$0xff]   ;;  %v1828_v49 = vld [vmem:[#allocation2 + $0x190] sm:$0xff]   ;;  %v1830_v51 = vld [vmem:[#allocation2 + $0x118] sm:$0xff]  }
  0x59   :  { %1539 = vmatpush3.bf16.msra.mxu1 %v1803_v15  ;;  %v1832_v52 = vld [vmem:[#allocation2 + $0x160] sm:$0xff]   ;;  %v1831_v53 = vld [vmem:[#allocation2 + $0x198] sm:$0xff]   ;;  %v1835_v55 = vld [vmem:[#allocation2 + $0x168] sm:$0xff]  }
  0x5a   :  { %1540 = vmatprep.subr.bf16.mxu1 %v1806_v18  ;;  %v1833_v54 = vld [vmem:[#allocation2 + $0x120] sm:$0xff]   ;;  %v1836_v57 = vld [vmem:[#allocation2 + $0x128] sm:$0xff]   ;;  %v1838_v58 = vld [vmem:[#allocation2 + $0x170] sm:$0xff]  }
  0x5b   :  { %1519 = vmatpush3.bf16.msra.mxu0 %v1805_v17  ;;  %v1834_v56 = vld [vmem:[#allocation2 + $0x1a0] sm:$0xff]   ;;  %v1837_v59 = vld [vmem:[#allocation2 + $0x1a8] sm:$0xff]   ;;  %v1839_v60 = vld [vmem:[#allocation2 + $0x130] sm:$0xff]  }
  0x5c   :  { %1520 = vmatprep.subr.bf16.mxu0 %v1808_v20  ;;  %v93_v61 = vld [vmem:[%s2356_s0 + $0x28] sm:$0xff]  ;;  %v1840_v62 = vld [vmem:[#allocation2 + $0x1b0] sm:$0xff]   ;;  %v1841_v63 = vld [vmem:[#allocation2 + $0x178] sm:$0xff]  }
  0x5d   :  { %1541 = vmatpush3.bf16.msra.mxu1 %v1807_v19  ;;  %v100_v0 = vpack.c.bf16 %v93_v61, %v93_v61  ;;  %v1842_v1 = vld [vmem:[#allocation2 + $0x138] sm:$0xff]   ;;  %v92_v2 = vld [vmem:[%s2356_s0 + $0x20] sm:$0xff]  ;;  %v94_v4 = vld [vmem:[%s2356_s0 + $0x30] sm:$0xff] }
  0x5e   :  { %1542 = vmatprep.subr.bf16.mxu1 %v1810_v22  ;;  %v1843_v3 = vld [vmem:[#allocation2 + $0x1b8] sm:$0xff]   ;;  %v99_v5 = vpack.c.bf16 %v92_v2, %v92_v2  ;;  %v101_v6 = vpack.c.bf16 %v94_v4, %v94_v4  ;;  %v1844_v7 = vld [vmem:[%s2358_s2] sm:$0xff]   ;;  %v1845_v8 = vld [vmem:[%s2358_s2 + $0x8] sm:$0xff]  }
  0x5f   :  { %1521 = vmatpush3.bf16.msra.mxu0 %v1809_v21  ;;  %v1846_v9 = vld [vmem:[%s2358_s2 + $0x10] sm:$0xff]   ;;  %v1847_v10 = vld [vmem:[%s2358_s2 + $0x18] sm:$0xff]   ;;  %v1848_v11 = vld [vmem:[%s2358_s2 + $0x20] sm:$0xff]   ;;  %v214_v21 = vlaneseq }
  0x60   :  { %1522 = vmatprep.subr.bf16.mxu0 %v1812_v24  ;;  %v1849_v12 = vld [vmem:[%s2358_s2 + $0x28] sm:$0xff]   ;;  %v1850_v13 = vld [vmem:[%s2358_s2 + $0x30] sm:$0xff]   ;;  %v1851_v14 = vld [vmem:[%s2358_s2 + $0x38] sm:$0xff]  }
  0x61   :  { %1543 = vmatpush3.bf16.msra.mxu1 %v1811_v23  ;;  %v1852_v15 = vld [vmem:[%s2359_s3] sm:$0xff]   ;;  %v1853_v16 = vld [vmem:[%s2359_s3 + $0x8] sm:$0xff]   ;;  %v1854_v17 = vld [vmem:[%s2359_s3 + $0x10] sm:$0xff]   ;;  %v2231_v22 = vshrl.u32 %v214_v21, 7 }
  0x62   :  { %1544 = vmatprep.subr.bf16.mxu1 %v1814_v26  ;;  %v1855_v18 = vld [vmem:[%s2359_s3 + $0x18] sm:$0xff]   ;;  %v1856_v19 = vld [vmem:[%s2359_s3 + $0x20] sm:$0xff]   ;;  %v1857_v20 = vld [vmem:[%s2359_s3 + $0x28] sm:$0xff]  }
  0x63   :  { %1523 = vmatpush3.bf16.msra.mxu0 %v1813_v25  ;;  %v216_v23 = vsub.s32 0, %v2231_v22  ;;  %v2234_v24 = vld [vmem:[#allocation8] sm:$0xff] }
  0x64   :  { %1524 = vmatprep.subr.bf16.mxu0 %v1816_v28 }
  0x65   :  { %1545 = vmatpush3.bf16.msra.mxu1 %v1815_v27  ;;  %v217_v26 = vrot.slane %v2234_v24, %v216_v23 }
  0x66   :  { %1546 = vmatprep.subr.bf16.mxu1 %v1818_v30 }
  0x67   :  { %1525 = vmatpush3.bf16.msra.mxu0 %v1817_v29 }
  0x68   :  { %1554 = vmatprep.subr.bf16.mxu0 %v1820_v36 }
  0x69   :  { %1547 = vmatpush3.bf16.msra.mxu1 %v1819_v33 }
  0x6a   :  { %587 = vmatmul.mubr.bf16.vlgmr.msra.gmra.mrb[0].mxu0 %v95_v35  ;;  %1639 = vmatprep.subr.bf16.mxu1 %v2020_v43 }
  0x6b   :  { %1555 = vmatpush3.bf16.msra.mxu0 %v1821_v39  ;;  %666 = vmatprep.mubr.bf16.mxu0 %v100_v0 }
  0x6c   :  { %627 = vmatmul.mubr.bf16.vlgmr.msra.gmra.mrb[0].mxu1 %v97_v41  ;;  %1556 = vmatprep.subr.bf16.mxu0 %v1823_v44 }
  0x6d   :  { %1640 = vmatpush3.bf16.msra.mxu1 %v1822_v42  ;;  %1655 = vmatprep.mubr.msk.bf16.mxu1 %vm2021_vm0, %v2020_v43 }
  0x6e   :  { %1641 = vmatprep.subr.bf16.mxu1 %v2020_v43 }
  0x6f   :  { %1557 = vmatpush3.bf16.msra.mxu0 %v1824_v45 }
  0x70   :  { %1558 = vmatprep.subr.bf16.mxu0 %v1826_v47 }
  0x71   :  { %1642 = vmatpush3.bf16.msra.mxu1 %v1825_v46 }
  0x72   :  { %1643 = vmatprep.subr.bf16.mxu1 %v2020_v43 }
  0x73   :  { %1559 = vmatpush3.bf16.msra.mxu0 %v1827_v48 }
  0x74   :  { %1560 = vmatprep.subr.bf16.mxu0 %v1829_v50 }
  0x75   :  { %1644 = vmatpush3.bf16.msra.mxu1 %v1828_v49 }
  0x76   :  { %1645 = vmatprep.subr.bf16.mxu1 %v2020_v43 }
  0x77   :  { %1561 = vmatpush3.bf16.msra.mxu0 %v1830_v51 }
  0x78   :  { %1562 = vmatprep.subr.bf16.mxu0 %v1832_v52  ;;  %v1858_v52 = vld [vmem:[%s2359_s3 + $0x30] sm:$0xff]  }
  0x79   :  { %1646 = vmatpush3.bf16.msra.mxu1 %v1831_v53  ;;  %v1859_v53 = vld [vmem:[%s2359_s3 + $0x38] sm:$0xff]  }
  0x7a   :  { %1647 = vmatprep.subr.bf16.mxu1 %v2020_v43 }
  0x7b   :  { %1563 = vmatpush3.bf16.msra.mxu0 %v1833_v54  ;;  %v1860_v54 = vld [vmem:[%s2360_s4] sm:$0xff]  }
  0x7c   :  { %1564 = vmatprep.subr.bf16.mxu0 %v1835_v55  ;;  %v1861_v55 = vld [vmem:[%s2360_s4 + $0x8] sm:$0xff]  }
  0x7d   :  { %1648 = vmatpush3.bf16.msra.mxu1 %v1834_v56  ;;  %v1862_v56 = vld [vmem:[%s2360_s4 + $0x10] sm:$0xff]  }
  0x7e   :  { %1649 = vmatprep.subr.bf16.mxu1 %v2020_v43 }
  0x7f   :  { %1565 = vmatpush3.bf16.msra.mxu0 %v1836_v57  ;;  %v1863_v57 = vld [vmem:[%s2360_s4 + $0x18] sm:$0xff]  }
  0x80   :  { %1566 = vmatprep.subr.bf16.mxu0 %v1838_v58  ;;  %v1864_v58 = vld [vmem:[%s2360_s4 + $0x20] sm:$0xff]  }
  0x81   :  { %1650 = vmatpush3.bf16.msra.mxu1 %v1837_v59  ;;  %v1865_v59 = vld [vmem:[%s2360_s4 + $0x28] sm:$0xff]  }
  0x82   :  { %1651 = vmatprep.subr.bf16.mxu1 %v2020_v43 }
  0x83   :  { %1567 = vmatpush3.bf16.msra.mxu0 %v1839_v60  ;;  %v734_v60 = vsub.s32 1, %v2231_v22 }
  0x84   :  { %1568 = vmatprep.subr.bf16.mxu0 %v1841_v63 }
  0x85   :  { %1652 = vmatpush3.bf16.msra.mxu1 %v1840_v62  ;;  %v735_v61 = vrot.slane %v2234_v24, %v734_v60  ;;  %v1890_v60 = vld [vmem:[%s2363_s7 + $0x30] sm:$0xff]  }
  0x86   :  { %1653 = vmatprep.subr.bf16.mxu1 %v2020_v43 }
  0x87   :  { %1569 = vmatpush3.bf16.msra.mxu0 %v1842_v1 }
  0x88   :  { %1659 = vmatprep.subr.bf16.mxu0 %v2020_v43 }
  0x89   :  { %1654 = vmatpush3.bf16.msra.mxu1 %v1843_v3 }
  0x8a   :  { %667 = vmatmul.mubr.bf16.vlgmr.msra.gmra.mrb[4].mxu0 %v99_v5  ;;  %1679 = vmatprep.subr.bf16.mxu1 %v2020_v43  ;;  %v1866_v5 = vld [vmem:[%s2360_s4 + $0x30] sm:$0xff]  }
  0x8b   :  { %1675 = vmatprep.mubr.msk.bf16.mxu0 %vm2021_vm0, %v2020_v43  ;;  %1660 = vmatpush3.bf16.msra.mxu0 %v1844_v7  ;;  %v1868_v7 = vld [vmem:[#allocation5] sm:$0xff]  }
  0x8c   :  { %1656 = vmatmul.mubr.bf16.vlgmr.msra.gmra.mrb[4].mxu1 %v101_v6  ;;  %1661 = vmatprep.subr.bf16.mxu0 %v2020_v43  ;;  %v1867_v6 = vld [vmem:[%s2360_s4 + $0x38] sm:$0xff]  }
  0x8d   :  { %1695 = vmatprep.mubr.msk.bf16.mxu1 %vm2021_vm0, %v2020_v43  ;;  %1680 = vmatpush3.bf16.msra.mxu1 %v1852_v15 }
  0x8e   :  { %1681 = vmatprep.subr.bf16.mxu1 %v2020_v43 }
  0x8f   :  { %1662 = vmatpush3.bf16.msra.mxu0 %v1845_v8  ;;  %v1869_v8 = vld [vmem:[#allocation5 + $0x8] sm:$0xff]  }
  0x90   :  { %1663 = vmatprep.subr.bf16.mxu0 %v2020_v43 }
  0x91   :  { %1682 = vmatpush3.bf16.msra.mxu1 %v1853_v16 }
  0x92   :  { %1683 = vmatprep.subr.bf16.mxu1 %v2020_v43 }
  0x93   :  { %1664 = vmatpush3.bf16.msra.mxu0 %v1846_v9  ;;  %v1870_v9 = vld [vmem:[#allocation5 + $0x10] sm:$0xff]  }
  0x94   :  { %1665 = vmatprep.subr.bf16.mxu0 %v2020_v43 }
  0x95   :  { %1684 = vmatpush3.bf16.msra.mxu1 %v1854_v17 }
  0x96   :  { %1685 = vmatprep.subr.bf16.mxu1 %v2020_v43 }
  0x97   :  { %1666 = vmatpush3.bf16.msra.mxu0 %v1847_v10  ;;  %v1871_v10 = vld [vmem:[#allocation5 + $0x18] sm:$0xff]  }
  0x98   :  { %1667 = vmatprep.subr.bf16.mxu0 %v2020_v43 }
  0x99   :  { %1686 = vmatpush3.bf16.msra.mxu1 %v1855_v18 }
  0x9a   :  { %1687 = vmatprep.subr.bf16.mxu1 %v2020_v43 }
  0x9b   :  { %1668 = vmatpush3.bf16.msra.mxu0 %v1848_v11  ;;  %v1872_v11 = vld [vmem:[#allocation5 + $0x20] sm:$0xff]  }
  0x9c   :  { %1669 = vmatprep.subr.bf16.mxu0 %v2020_v43 }
  0x9d   :  { %1688 = vmatpush3.bf16.msra.mxu1 %v1856_v19 }
  0x9e   :  { %1689 = vmatprep.subr.bf16.mxu1 %v2020_v43 }
  0x9f   :  { %1670 = vmatpush3.bf16.msra.mxu0 %v1849_v12  ;;  %v1873_v12 = vld [vmem:[#allocation5 + $0x28] sm:$0xff]  }
  0xa0   :  { %1671 = vmatprep.subr.bf16.mxu0 %v2020_v43 }
  0xa1   :  { %1690 = vmatpush3.bf16.msra.mxu1 %v1857_v20 }
  0xa2   :  { %1691 = vmatprep.subr.bf16.mxu1 %v2020_v43 }
  0xa3   :  { %1672 = vmatpush3.bf16.msra.mxu0 %v1850_v13  ;;  %v844_v13 = vsub.s32 2, %v2231_v22 }
  0xa4   :  { %1673 = vmatprep.subr.bf16.mxu0 %v2020_v43 }
  0xa5   :  { %1692 = vmatpush3.bf16.msra.mxu1 %v1858_v52 }
  0xa6   :  { %1693 = vmatprep.subr.bf16.mxu1 %v2020_v43 }
  0xa7   :  { %1674 = vmatpush3.bf16.msra.mxu0 %v1851_v14  ;;  %v845_v14 = vrot.slane %v2234_v24, %v844_v13 }
  0xa8   :  { %1699 = vmatprep.subr.bf16.mxu0 %v2020_v43 }
  0xa9   :  { %1694 = vmatpush3.bf16.msra.mxu1 %v1859_v53 }
  0xaa   :  { %1719 = vmatprep.subr.bf16.mxu1 %v2020_v43 }
 0x13d   :  { %v1526_v25 = vpop.f32.mrb[0].mxu0 }
 0x13e   :  { %v1527_v27 = vpop.f32.mrb[1].mxu0 }
 0x13f   :  { %v1528_v28 = vadd.f32 %v1527_v27, %v1526_v25  ;;  %v1529_v29 = vpop.f32.mrb[2].mxu0  ;;  %v1548_v30 = vpop.f32.mrb[0].mxu1  ;;  %v1874_v25 = vld [vmem:[#allocation5 + $0x30] sm:$0xff]   ;;  %v1876_v27 = vld [vmem:[#allocation7] sm:$0xff]  }
 0x140   :  { %v1530_v31 = vpop.f32.mrb[3].mxu0  ;;  %v1549_v33 = vpop.f32.mrb[1].mxu1  ;;  %v1878_v29 = vld [vmem:[#allocation7 + $0x10] sm:$0xff]  }
 0x141   :  { %v589_v32 = vadd.f32 %v1528_v28, %v217_v26  ;;  %v1550_v34 = vadd.f32 %v1549_v33, %v1548_v30  ;;  %v1551_v35 = vpop.f32.mrb[2].mxu1  ;;  %v1875_v26 = vld [vmem:[#allocation5 + $0x38] sm:$0xff]   ;;  %v1877_v28 = vld [vmem:[#allocation7 + $0x8] sm:$0xff]   ;;  %v1880_v31 = vld [vmem:[#allocation7 + $0x20] sm:$0xff]   ;;  %v954_v33 = vsub.s32 3, %v2231_v22 }
 0x142   :  { %v1552_v36 = vpop.f32.mrb[3].mxu1  ;;  %v1879_v30 = vld [vmem:[#allocation7 + $0x18] sm:$0xff]  }
 0x143   :  { %v629_v37 = vadd.f32 %v1550_v34, %v589_v32  ;;  %v1881_v32 = vld [vmem:[#allocation7 + $0x28] sm:$0xff]   ;;  %v955_v34 = vrot.slane %v2234_v24, %v954_v33 }
 0x15d   :  { %v1570_v38 = vpop.f32.mrb[4].mxu0 }
 0x15e   :  { %v1571_v39 = vpop.f32.mrb[5].mxu0 }
 0x15f   :  { %v1572_v40 = vadd.f32 %v1571_v39, %v1570_v38  ;;  %v1573_v41 = vpop.f32.mrb[6].mxu0  ;;  %v708_v42 = vpop.f32.mrb[4].mxu1 }
 0x160   :  { %v1574_v44 = vpop.f32.mrb[7].mxu0  ;;  %v1657_v46 = vpop.f32.mrb[5].mxu1 }
 0x161   :  { %v669_v45 = vadd.f32 %v1572_v40, %v629_v37  ;;  %v711_v47 = vpop.f32.mrb[6].mxu1  ;;  %v1883_v44 = vld [vmem:[#allocation7 + $0x38] sm:$0xff]   ;;  %v1885_v46 = vld [vmem:[%s2363_s7 + $0x8] sm:$0xff]  }
 0x162   :  { %v1658_v49 = vpop.f32.mrb[7].mxu1  ;;  %v1886_v47 = vld [vmem:[%s2363_s7 + $0x10] sm:$0xff]  }
 0x163   :  { %v709_v48 = vadd.f32 %v708_v42, %v669_v45  ;;  %v1882_v42 = vld [vmem:[#allocation7 + $0x30] sm:$0xff]   ;;  %v1884_v45 = vld [vmem:[%s2363_s7] sm:$0xff]  }
 0x164   :  { %v1888_v49 = vld [vmem:[%s2363_s7 + $0x20] sm:$0xff]  }
 0x165   :  { %v714_v50 = vmax.f32 %v709_v48, 0.0  ;;  %v1887_v48 = vld [vmem:[%s2363_s7 + $0x18] sm:$0xff]  }
 0x167   :  { %v715_v51 = vpack.c.bf16 %v714_v50, %v714_v50  ;;  %v1889_v50 = vld [vmem:[%s2363_s7 + $0x28] sm:$0xff]  }
 0x169   :  { %1676 = vmatmul.mubr.bf16.vlgmr.msra.gmra.mrb[8].mxu0 %v715_v51  ;;  %v1064_v51 = vsub.s32 4, %v2231_v22 }
 0x16a   :  { %1715 = vmatprep.mubr.msk.bf16.mxu0 %vm2021_vm0, %v2020_v43  ;;  %1700 = vmatpush3.bf16.msra.mxu0 %v1860_v54 }
 0x16b   :  { %1701 = vmatprep.subr.bf16.mxu0 %v2020_v43  ;;  %v1065_v52 = vrot.slane %v2234_v24, %v1064_v51 }
 0x16e   :  { %1702 = vmatpush3.bf16.msra.mxu0 %v1861_v55 }
 0x16f   :  { %1703 = vmatprep.subr.bf16.mxu0 %v2020_v43 }
 0x172   :  { %1704 = vmatpush3.bf16.msra.mxu0 %v1862_v56 }
 0x173   :  { %1705 = vmatprep.subr.bf16.mxu0 %v2020_v43 }
 0x176   :  { %1706 = vmatpush3.bf16.msra.mxu0 %v1863_v57 }
 0x177   :  { %1707 = vmatprep.subr.bf16.mxu0 %v2020_v43 }
 0x17a   :  { %1708 = vmatpush3.bf16.msra.mxu0 %v1864_v58 }
 0x17b   :  { %1709 = vmatprep.subr.bf16.mxu0 %v2020_v43 }
 0x17e   :  { %1710 = vmatpush3.bf16.msra.mxu0 %v1865_v59 }
 0x17f   :  { %1711 = vmatprep.subr.bf16.mxu0 %v2020_v43 }
 0x182   :  { %1712 = vmatpush3.bf16.msra.mxu0 %v1866_v5 }
 0x183   :  { %1713 = vmatprep.subr.bf16.mxu0 %v2020_v43 }
 0x186   :  { %1714 = vmatpush3.bf16.msra.mxu0 %v1867_v6 }
 0x187   :  { %1739 = vmatprep.subr.bf16.mxu0 %v2020_v43 }
 0x23c   :  { %v818_v62 = vpop.f32.mrb[8].mxu0 }
 0x23d   :  { %v819_v63 = vadd.f32 %v818_v62, %v735_v61  ;;  %v1677_v0 = vpop.f32.mrb[9].mxu0  ;;  %v1891_v61 = vld [vmem:[%s2363_s7 + $0x38] sm:$0xff]   ;;  %v1174_v62 = vsub.s32 5, %v2231_v22  ;;  %s2022_s7 = smov [#allocation10]  }
 0x23e   :  { %v821_v1 = vpop.f32.mrb[10].mxu0  ;;  %s1395_s10 = sshll.u32 %s2022_s7, 4  ;;  %s1396_s10 = int_to_ptr.vmem [resolvable:$true] %s1395_s10 }
 0x23f   :  { %v824_v2 = vmax.f32 %v819_v63, 0.0  ;;  %v1678_v3 = vpop.f32.mrb[11].mxu0  ;;  %v1175_v63 = vrot.slane %v2234_v24, %v1174_v62  ;;  %s1984_s14 = scalar_lea.vmem %s1396_s10, 128  ;;  %p1989_p5 = scmp.lt.s32.totalorder %s1396_s10, %s1396_s10 }
 0x240   :  { %p1985_p4 = scmp.ne.s32.totalorder %s1396_s10, %s1984_s14  ;;  %p1990_p6 = scmp.lt.s32.totalorder %s1984_s14, %s1984_s14 }
 0x241   :  { %v825_v4 = vpack.c.bf16 %v824_v2, %v824_v2 }
 0x242   :  { %p1991_p7 = por %p1990_p6, %p1989_p5 }
 0x243   :  { %1696 = vmatmul.mubr.bf16.vlgmr.msra.gmra.mrb[8].mxu1 %v825_v4 }
 0x244   :  { %1735 = vmatprep.mubr.msk.bf16.mxu1 %vm2021_vm0, %v2020_v43  ;;  %1720 = vmatpush3.bf16.msra.mxu1 %v1868_v7  ;;  %v1284_v7 = vsub.s32 6, %v2231_v22  ;;  %p1992_p8 = pnand %p1991_p7, %p1985_p4 }
 0x245   :  { %1721 = vmatprep.subr.bf16.mxu1 %v2020_v43 }
 0x248   :  { %1722 = vmatpush3.bf16.msra.mxu1 %v1869_v8  ;;  %v1376_v8 = vand.u32 127, %v214_v21 }
 0x249   :  { %1723 = vmatprep.subr.bf16.mxu1 %v2020_v43 }
 0x24a   :  { %vm1377_vm1 = vcmp.lt.s32.totalorder %v1376_v8, 5 }
 0x24c   :  { %1724 = vmatpush3.bf16.msra.mxu1 %v1870_v9 }
 0x24d   :  { %1725 = vmatprep.subr.bf16.mxu1 %v2020_v43 }
 0x250   :  { %1726 = vmatpush3.bf16.msra.mxu1 %v1871_v10 }
 0x251   :  { %1727 = vmatprep.subr.bf16.mxu1 %v2020_v43 }
 0x254   :  { %1728 = vmatpush3.bf16.msra.mxu1 %v1872_v11 }
 0x255   :  { %1729 = vmatprep.subr.bf16.mxu1 %v2020_v43 }
 0x258   :  { %1730 = vmatpush3.bf16.msra.mxu1 %v1873_v12 }
 0x259   :  { %1731 = vmatprep.subr.bf16.mxu1 %v2020_v43 }
 0x25c   :  { %1732 = vmatpush3.bf16.msra.mxu1 %v1874_v25 }
 0x25d   :  { %1733 = vmatprep.subr.bf16.mxu1 %v2020_v43 }
 0x260   :  { %1734 = vmatpush3.bf16.msra.mxu1 %v1875_v26 }
 0x261   :  { %1759 = vmatprep.subr.bf16.mxu1 %v2020_v43 }
 0x316   :  { %v928_v15 = vpop.f32.mrb[8].mxu1 }
 0x317   :  { %v929_v16 = vadd.f32 %v928_v15, %v845_v14  ;;  %v1697_v17 = vpop.f32.mrb[9].mxu1 }
 0x318   :  { %v931_v18 = vpop.f32.mrb[10].mxu1 }
 0x319   :  { %v934_v19 = vmax.f32 %v929_v16, 0.0  ;;  %v1698_v20 = vpop.f32.mrb[11].mxu1 }
 0x31b   :  { %v935_v23 = vpack.c.bf16 %v934_v19, %v934_v19 }
 0x31d   :  { %1716 = vmatmul.mubr.bf16.vlgmr.msra.gmra.mrb[12].mxu0 %v935_v23 }
 0x31e   :  { %1755 = vmatprep.mubr.msk.bf16.mxu0 %vm2021_vm0, %v2020_v43  ;;  %1740 = vmatpush3.bf16.msra.mxu0 %v1876_v27 }
 0x31f   :  { %1741 = vmatprep.subr.bf16.mxu0 %v2020_v43 }
 0x322   :  { %1742 = vmatpush3.bf16.msra.mxu0 %v1877_v28 }
 0x323   :  { %1743 = vmatprep.subr.bf16.mxu0 %v2020_v43 }
 0x326   :  { %1744 = vmatpush3.bf16.msra.mxu0 %v1878_v29 }
 0x327   :  { %1745 = vmatprep.subr.bf16.mxu0 %v2020_v43 }
 0x32a   :  { %1746 = vmatpush3.bf16.msra.mxu0 %v1879_v30 }
 0x32b   :  { %1747 = vmatprep.subr.bf16.mxu0 %v2020_v43 }
 0x32e   :  { %1748 = vmatpush3.bf16.msra.mxu0 %v1880_v31 }
 0x32f   :  { %1749 = vmatprep.subr.bf16.mxu0 %v2020_v43 }
 0x332   :  { %1750 = vmatpush3.bf16.msra.mxu0 %v1881_v32 }
 0x333   :  { %1751 = vmatprep.subr.bf16.mxu0 %v2020_v43 }
 0x336   :  { %1752 = vmatpush3.bf16.msra.mxu0 %v1882_v42 }
 0x337   :  { %1753 = vmatprep.subr.bf16.mxu0 %v2020_v43 }
 0x33a   :  { %1754 = vmatpush3.bf16.msra.mxu0 %v1883_v44 }
 0x3f0   :  { %v1038_v35 = vpop.f32.mrb[12].mxu0 }
 0x3f1   :  { %v1039_v36 = vadd.f32 %v1038_v35, %v955_v34  ;;  %v1717_v37 = vpop.f32.mrb[13].mxu0 }
 0x3f2   :  { %v1041_v38 = vpop.f32.mrb[14].mxu0 }
 0x3f3   :  { %v1044_v39 = vmax.f32 %v1039_v36, 0.0  ;;  %v1718_v40 = vpop.f32.mrb[15].mxu0 }
 0x3f5   :  { %v1045_v41 = vpack.c.bf16 %v1044_v39, %v1044_v39 }
 0x3f7   :  { %1736 = vmatmul.mubr.bf16.vlgmr.msra.gmra.mrb[12].mxu1 %v1045_v41 }
 0x3f8   :  { %1775 = vmatprep.mubr.msk.bf16.mxu1 %vm2021_vm0, %v2020_v43  ;;  %1760 = vmatpush3.bf16.msra.mxu1 %v1884_v45 }
 0x3f9   :  { %1761 = vmatprep.subr.bf16.mxu1 %v2020_v43 }
 0x3fc   :  { %1762 = vmatpush3.bf16.msra.mxu1 %v1885_v46 }
 0x3fd   :  { %1763 = vmatprep.subr.bf16.mxu1 %v2020_v43 }
 0x400   :  { %1764 = vmatpush3.bf16.msra.mxu1 %v1886_v47 }
 0x401   :  { %1765 = vmatprep.subr.bf16.mxu1 %v2020_v43 }
 0x404   :  { %1766 = vmatpush3.bf16.msra.mxu1 %v1887_v48 }
 0x405   :  { %1767 = vmatprep.subr.bf16.mxu1 %v2020_v43 }
 0x408   :  { %1768 = vmatpush3.bf16.msra.mxu1 %v1888_v49 }
 0x409   :  { %1769 = vmatprep.subr.bf16.mxu1 %v2020_v43 }
 0x40c   :  { %1770 = vmatpush3.bf16.msra.mxu1 %v1889_v50 }
 0x40d   :  { %1771 = vmatprep.subr.bf16.mxu1 %v2020_v43 }
 0x410   :  { %1772 = vmatpush3.bf16.msra.mxu1 %v1890_v60 }
 0x411   :  { %1773 = vmatprep.subr.bf16.mxu1 %v2020_v43  ;;  %v1285_v43 = vrot.slane %v2234_v24, %v1284_v7 }
 0x414   :  { %1774 = vmatpush3.bf16.msra.mxu1 %v1891_v61 }
 0x4ca   :  { %v1148_v53 = vpop.f32.mrb[12].mxu1 }
 0x4cb   :  { %v1149_v54 = vadd.f32 %v1148_v53, %v1065_v52  ;;  %v1737_v55 = vpop.f32.mrb[13].mxu1 }
 0x4cc   :  { %v1151_v56 = vpop.f32.mrb[14].mxu1 }
 0x4cd   :  { %v1154_v57 = vmax.f32 %v1149_v54, 0.0  ;;  %v1738_v58 = vpop.f32.mrb[15].mxu1 }
 0x4cf   :  { %v1155_v59 = vpack.c.bf16 %v1154_v57, %v1154_v57 }
 0x4d1   :  { %1756 = vmatmul.mubr.bf16.vlgmr.msra.gmra.mrb[16].mxu0 %v1155_v59 }
 0x5a4   :  { %v1258_v0 = vpop.f32.mrb[16].mxu0 }
 0x5a5   :  { %v1259_v1 = vadd.f32 %v1258_v0, %v1175_v63  ;;  %v1757_v2 = vpop.f32.mrb[17].mxu0 }
 0x5a6   :  { %v1261_v3 = vpop.f32.mrb[18].mxu0 }
 0x5a7   :  { %v1264_v4 = vmax.f32 %v1259_v1, 0.0  ;;  %v1758_v5 = vpop.f32.mrb[19].mxu0 }
 0x5a9   :  { %v1265_v6 = vpack.c.bf16 %v1264_v4, %v1264_v4 }
 0x5ab   :  { %1776 = vmatmul.mubr.bf16.vlgmr.msra.gmra.mrb[16].mxu1 %v1265_v6 }
 0x67e   :  { %v1368_v9 = vpop.f32.mrb[16].mxu1 }
 0x67f   :  { %v1369_v10 = vadd.f32 %v1368_v9, %v1285_v43  ;;  %v1777_v11 = vpop.f32.mrb[17].mxu1 }
 0x680   :  { %v1371_v12 = vpop.f32.mrb[18].mxu1 }
 0x681   :  { %v1374_v13 = vmax.f32 %v1369_v10, 0.0  ;;  %v1778_v14 = vpop.f32.mrb[19].mxu1 }
 0x683   :  { %v1378_v15 = vsel %vm1377_vm1, %v1374_v13, -1e+30 }
 0x684   :  { %1379 = vmax.xlane.f32.xlu0 %v1378_v15 }
 0x711   :  { %v1380_v16 = vpop.xlane.xlu0 %1379 }
 0x712   :  { %v1381_v17 = vsub.f32 %v1378_v15, %v1380_v16 }
 0x714   :  { %v1382_v18 = vmul.f32 1.442695, %v1381_v17 }
 0x716   :  { %1892 = vpow2.f32 %v1382_v18 }
 0x720   :  { %v1893_v19 = vpop.eup %1892 }
 0x721   :  { %1384 = vadd.xlane.f32.xlu0 %v1893_v19 }
 0x7ae   :  { %v1385_v22 = vpop.xlane.xlu0 %1384 }
 0x7af   :  { %1894 = vrcp.f32 %v1385_v22 }
 0x7b9   :  { %v1895_v21 = vpop.eup %1894 }
 0x7ba   :  { %v1387_v24 = vmul.f32 %v1895_v21, %v1893_v19 }
 0x7bc   :  { %1388 = vst [vmem:[#allocation10] sm:$0xff] %v1387_v24 }
 0x7bd   :  { %1995 = shalt.err (!%p1992_p8)
}
 0x7be   :  { %s1996_s21 = scalar_lea.hbm %s2365_s9, 128 }
 0x7bf   :  { %p1997_p9 = scmp.ne.s32.totalorder %s2365_s9, %s1996_s21  ;;  %p2000_p10 = scmp.lt.u32.totalorder %s1996_s21, %s2365_s9 }
 0x7c1   :  { %p2002_p11 = pnand %p2000_p10, %p1997_p9 }
 0x7c3   :  { %2005 = shalt.err (!%p2002_p11)
}
 0x7c4   :  { %1398 = dma.vmem_to_hbm [thread:$0]  %s1396_s10, 128, %s2365_s9, [#allocation4]  }
 0x7c5   :  { %2012 = dma.done.wait [#allocation4], 128  }
 0x7c6   :  { %2013 = vsyncadd [#allocation4], 4294967168 }
 0x7c7   :  { %1402 = vsyncpa [#allocation3], 1 }
 0x7c8   :  { %1403 = vsyncpa [#allocation6], 1 }
 0x7c9   :  { %1404 = vsyncpa [#allocation9], 1 }
 0x7ca   :  { %1405 = vsyncpa [#allocation4], 1 }

</bundles_post_ra>
